<compile_context>
chip_gen: v6e
topology: v6e:2x2x1
jax: 0.10.0
libtpu: 0.0.40
codegen_flags: <defaults>
</compile_context>

<pallas_src>
import numpy as np
import jax
import jax.numpy as jnp
from jax.experimental import pallas as pl
from jax.experimental.pallas import tpu as pltpu

K_SIZE = 5
PAD = K_SIZE // 2
MAX_LEVELS = 3
SIGMA = 2.0  # make_laplacian_pyramid always calls conv_gauss with sigma=2.0


def gauss_kernel(size=K_SIZE, sigma=SIGMA):
    # Verbatim reproduction of LapacianPyramidLoss.gauss_kernel (including the
    # sum over axis=2 and the exp(...)**2 quirk), as deterministic numpy.
    grid = np.float32(np.mgrid[0:size, 0:size].T)
    gaussian = lambda x: np.exp((x - size // 2) ** 2 / (-2 * sigma ** 2)) ** 2
    kernel = np.sum(gaussian(grid), axis=2)
    kernel /= np.sum(kernel)
    return np.asarray(kernel, dtype=np.float32)


GAUSS = gauss_kernel()  # (5, 5) float32 compile-time constant

# The quirky kernel is rank-2: GAUSS[i, j] = W1D[i] + W1D[j].  Recover the 1-D
# weights exactly (row_sum[i] = 5*W1D[i] + sum(W1D), sum(W1D) = 0.1) and verify
# both the decomposition and the weight symmetry at import time.
W1D = ((GAUSS.sum(axis=1) - np.float32(0.1)) / np.float32(K_SIZE)).astype(np.float32)
assert np.allclose(GAUSS, W1D[:, None] + W1D[None, :], rtol=1e-5, atol=1e-6)
assert np.allclose(W1D[0], W1D[4]) and np.allclose(W1D[1], W1D[3])


def _make_kernel(H, W, B, NC, slot):
    """Kernel for one grid step: B planes of img1/img2 (native dtype), packed
    along the lane axis into a zero-haloed f32 scratch; rank-2 separable 5x5
    gaussian blur of the diff; per-block L1 partial sums."""
    Hp = H + 2 * PAD                 # padded rows
    SW = B * slot                    # packed (padded) lane width
    CW = SW - 2 * PAD                # "centered" output lane width
    w0, w1, w2 = float(W1D[0]), float(W1D[1]), float(W1D[2])
    ragged = (NC % B) != 0
    need_mask = B > 1

    def kernel(a_ref, b_ref, lap_ref, img_ref, dp_ref, box_ref, wrow_ref):
        # ---- stage 1: packed, zero-padded diff built in VMEM (no HBM pre-pass)
        dp_ref[...] = jnp.zeros_like(dp_ref)        # halos/gaps (rewritten each step)
        base = pl.program_id(0) * B
        for q in range(B):
            dq = a_ref[q].astype(jnp.float32) - b_ref[q].astype(jnp.float32)
            if ragged:
                # Out-of-range planes of the last block carry garbage; select
                # (not multiply) so NaN garbage cannot leak into the sums.
                dq = jnp.where(base + q < NC, dq, 0.0)
            c0 = PAD + q * slot
            dp_ref[PAD:PAD + H, c0:c0 + W] = dq

        # ---- stage 2: lane-axis passes, sharing the 5 shifted ref loads ----
        l0 = dp_ref[:, 0:CW]
        l1 = dp_ref[:, 1:1 + CW]
        l2 = dp_ref[:, 2:2 + CW]
        l3 = dp_ref[:, 3:3 + CW]
        l4 = dp_ref[:, 4:4 + CW]
        e04 = l0 + l4
        e13 = l1 + l3
        box_ref[...] = (e04 + e13) + l2                  # unweighted 1x5 box sum
        wrow_ref[...] = w0 * e04 + w1 * e13 + w2 * l2    # weighted 1x5 row pass

        # ---- stage 3: sublane-axis pass (ref slices of the staged rows) ----
        # blur = sum_i w[i]*box[y+i] + sum_i wrow[y+i]  ==  GAUSS "SAME" conv.
        blur = (w0 * (box_ref[0:H, :] + box_ref[4:4 + H, :])
                + w1 * (box_ref[1:1 + H, :] + box_ref[3:3 + H, :])
                + w2 * box_ref[2:2 + H, :]
                + ((wrow_ref[0:H, :] + wrow_ref[4:4 + H, :])
                   + (wrow_ref[1:1 + H, :] + wrow_ref[3:3 + H, :])
                   + wrow_ref[2:2 + H, :]))
        d = dp_ref[PAD:PAD + H, PAD:PAD + CW]            # centered diff (halos are 0)
        lap = jnp.abs(d - blur)                          # identical for every level

        if need_mask:
            # Exclude the 4 zero-gap lanes between packed plane interiors
            # (their blur is nonzero); the diff there is exactly 0 already.
            cols = jax.lax.broadcasted_iota(jnp.int32, (1, CW), 1)
            interior = cols < 0
            for q in range(B):
                lo = q * slot
                interior = interior | ((cols >= lo) & (cols < lo + W))
            lap = jnp.where(interior, lap, 0.0)

        s_lap = jnp.sum(lap)
        s_img = jnp.sum(jnp.abs(d))
        # Per-block partials splatted over a lane-dense (8,128) tile; wrapper
        # reads element [:,0,0].  No carried state -> grid axis is "parallel".
        lap_ref[...] = jnp.broadcast_to(s_lap, (1, 8, 128))
        img_ref[...] = jnp.broadcast_to(s_img, (1, 8, 128))

    return kernel


def _choose_block(NC, H, W, itemsize):
    """Planes per grid step (packed along lanes)."""
    slot = W + 2 * PAD
    Hp = H + 2 * PAD
    cap = NC if NC <= 1 else pl.cdiv(NC, 2)                  # >=2 grid steps (megacore)
    b = min(cap, 64)                                         # bound trace-time unroll
    b = min(b, max(1, 1024 // slot))                         # ~8 vregs of packed lanes
    b = min(b, max(1, (6 << 20) // (3 * Hp * slot * 4)))     # f32 scratch budget
    b = min(b, max(1, (8 << 20) // (4 * H * W * max(itemsize, 1))))  # 2 ins x 2 bufs
    return max(1, b)


def lapacian_pyramid_loss(img1, img2, max_levels=MAX_LEVELS, block_planes=None):
    N, C, H, W = img1.shape
    NC = N * C

    # Free views; native dtype kept in HBM (cast to f32 happens inside the kernel).
    a = img1.reshape(NC, H, W)
    b = img2.reshape(NC, H, W)

    if block_planes is None:
        B = _choose_block(NC, H, W, a.dtype.itemsize)
    else:
        B = int(block_planes)
    B = max(1, min(B, NC))
    slot = W + 2 * PAD
    Hp, SW = H + 2 * PAD, B * slot
    CW = SW - 2 * PAD
    G = pl.cdiv(NC, B)

    kernel = _make_kernel(H, W, B, NC, slot)
    lap_part, img_part = pl.pallas_call(
        kernel,
        out_shape=(jax.ShapeDtypeStruct((G, 8, 128), jnp.float32),
                   jax.ShapeDtypeStruct((G, 8, 128), jnp.float32)),
        grid_spec=pltpu.PrefetchScalarGridSpec(
            num_scalar_prefetch=0,
            grid=(G,),
            in_specs=[pl.BlockSpec((B, H, W), lambda i: (i, 0, 0)),
                      pl.BlockSpec((B, H, W), lambda i: (i, 0, 0))],
            out_specs=(pl.BlockSpec((1, 8, 128), lambda i: (i, 0, 0)),
                       pl.BlockSpec((1, 8, 128), lambda i: (i, 0, 0))),
            scratch_shapes=[pltpu.VMEM((Hp, SW), jnp.float32),   # packed padded diff
                            pltpu.VMEM((Hp, CW), jnp.float32),   # 1x5 box sums
                            pltpu.VMEM((Hp, CW), jnp.float32)],  # weighted 1x5 rows
        ),
        compiler_params=pltpu.CompilerParams(
            dimension_semantics=("parallel",),       # independent per-block partials
            vmem_limit_bytes=32 * 1024 * 1024,       # safe on v5e/v6e/v7x
        ),
    )(a, b)

    lap_sum = jnp.sum(lap_part[:, 0, 0])
    img_sum = jnp.sum(img_part[:, 0, 0])

    # Per-level loss = ||a-b||_1 / numel(a).  Every level has the same numel
    # (no downsampling in the reference code).  Final scale by batch size.
    numel = jnp.float32(N * C * H * W)
    loss = (jnp.float32(max_levels) * lap_sum + img_sum) / numel
    return loss * jnp.float32(N)


def reference_loss(img1, img2, max_levels=MAX_LEVELS):
    """Pure numpy reference of the same forward semantics (full 25-tap conv)."""
    img1 = np.asarray(img1, np.float32)
    img2 = np.asarray(img2, np.float32)
    N, C, H, W = img1.shape

    def blur(x):
        xp = np.pad(x, ((0, 0), (0, 0), (PAD, PAD), (PAD, PAD)))
        out = np.zeros_like(x)
        for i in range(K_SIZE):
            for j in range(K_SIZE):
                out += GAUSS[i, j] * xp[:, :, i:i + H, j:j + W]
        return out

    pyr1 = [img1 - blur(img1)] * max_levels + [img1]
    pyr2 = [img2 - blur(img2)] * max_levels + [img2]
    losses = [np.sum(np.abs(a - b)) / float(a.size) for a, b in zip(pyr1, pyr2)]
    return float(np.sum(losses) * N)


if __name__ == "__main__":
    key = jax.random.PRNGKey(0)
    k1, k2, k3, k4, k5, k6 = jax.random.split(key, 6)

    # Primary test: 8 planes, B=4 packed along lanes, 2 grid steps, no ragged tail.
    shape = (2, 4, 16, 16)  # N, C, H, W
    img1 = jax.random.normal(k1, shape, dtype=jnp.float32)
    img2 = jax.random.normal(k2, shape, dtype=jnp.float32)
    loss = jax.block_until_ready(lapacian_pyramid_loss(img1, img2))
    ref = reference_loss(np.asarray(img1), np.asarray(img2))
    assert np.allclose(float(loss), ref, rtol=1e-4, atol=1e-5), (float(loss), ref)

    # Ragged tail: NC=3 planes with B=2 -> last block half-empty, masked in-kernel.
    shape2 = (1, 3, 24, 40)
    a = jax.random.normal(k3, shape2, dtype=jnp.float32)
    b = jax.random.normal(k4, shape2, dtype=jnp.float32)
    loss2 = jax.block_until_ready(lapacian_pyramid_loss(a, b))
    ref2 = reference_loss(np.asarray(a), np.asarray(b))
    assert np.allclose(float(loss2), ref2, rtol=1e-4, atol=1e-5), (float(loss2), ref2)

    # bf16 inputs: HBM stays bf16 (half the DMA bytes), f32 cast happens in-kernel.
    shape3 = (2, 2, 16, 16)
    c = jax.random.normal(k5, shape3, dtype=jnp.float32).astype(jnp.bfloat16)
    d = jax.random.normal(k6, shape3, dtype=jnp.float32).astype(jnp.bfloat16)
    loss3 = jax.block_until_ready(lapacian_pyramid_loss(c, d))
    ref3 = reference_loss(np.asarray(c.astype(jnp.float32)),
                          np.asarray(d.astype(jnp.float32)))
    assert np.allclose(float(loss3), ref3, rtol=1e-4, atol=1e-5), (float(loss3), ref3)

    print("KERNEL_OK")
</pallas_src>

<mosaic_0001>
module attributes {stable_mosaic.version = 11 : i64} {
  func.func @kernel(%arg0: i32, %arg1: memref<4x16x16xf32, #tpu.memory_space<vmem>>, %arg2: memref<4x16x16xf32, #tpu.memory_space<vmem>>, %arg3: memref<1x8x128xf32, #tpu.memory_space<vmem>>, %arg4: memref<1x8x128xf32, #tpu.memory_space<vmem>>, %arg5: memref<20x80xf32, #tpu.memory_space<vmem>>, %arg6: memref<20x76xf32, #tpu.memory_space<vmem>>, %arg7: memref<20x76xf32, #tpu.memory_space<vmem>>) attributes {dimension_semantics = [#tpu.dimension_semantics<parallel>], iteration_bounds = array<i64: 2>, scalar_prefetch = 0 : i64, scratch_operands = 3 : i64, tpu.core_type = #tpu.core_type<tc>, window_params = [{transform_indices = @transform_0, window_bounds = array<i64: 4, 16, 16>}, {transform_indices = @transform_1, window_bounds = array<i64: 4, 16, 16>}, {transform_indices = @transform_2, window_bounds = array<i64: 1, 8, 128>}, {transform_indices = @transform_3, window_bounds = array<i64: 1, 8, 128>}]} {
    %cst = arith.constant 0.000000e+00 : f32
    %0 = vector.broadcast %cst : f32 to vector<20x80xf32>
    %c0 = arith.constant 0 : index
    %c0_0 = arith.constant 0 : index
    %1 = vector.load %arg5[%c0, %c0_0] : memref<20x80xf32, #tpu.memory_space<vmem>>, vector<20x80xf32>
    tpu.vector_store %arg5[%c0, %c0_0], %0 {strides = array<i32>} : memref<20x80xf32, #tpu.memory_space<vmem>>, vector<20x80xf32>,
    %c0_1 = arith.constant 0 : index
    %c0_2 = arith.constant 0 : index
    %c0_3 = arith.constant 0 : index
    %2 = vector.load %arg1[%c0_1, %c0_2, %c0_3] : memref<4x16x16xf32, #tpu.memory_space<vmem>>, vector<1x16x16xf32>
    %3 = vector.shape_cast %2 : vector<1x16x16xf32> to vector<16x16xf32>
    %c0_4 = arith.constant 0 : index
    %c0_5 = arith.constant 0 : index
    %c0_6 = arith.constant 0 : index
    %4 = vector.load %arg2[%c0_4, %c0_5, %c0_6] : memref<4x16x16xf32, #tpu.memory_space<vmem>>, vector<1x16x16xf32>
    %5 = vector.shape_cast %4 : vector<1x16x16xf32> to vector<16x16xf32>
    %6 = arith.subf %3, %5 : vector<16x16xf32>
    %c2 = arith.constant 2 : index
    %c2_7 = arith.constant 2 : index
    %7 = vector.load %arg5[%c2, %c2_7] : memref<20x80xf32, #tpu.memory_space<vmem>>, vector<16x16xf32>
    tpu.vector_store %arg5[%c2, %c2_7], %6 {strides = array<i32>} : memref<20x80xf32, #tpu.memory_space<vmem>>, vector<16x16xf32>,
    %c1 = arith.constant 1 : index
    %c0_8 = arith.constant 0 : index
    %c0_9 = arith.constant 0 : index
    %8 = vector.load %arg1[%c1, %c0_8, %c0_9] : memref<4x16x16xf32, #tpu.memory_space<vmem>>, vector<1x16x16xf32>
    %9 = vector.shape_cast %8 : vector<1x16x16xf32> to vector<16x16xf32>
    %c1_10 = arith.constant 1 : index
    %c0_11 = arith.constant 0 : index
    %c0_12 = arith.constant 0 : index
    %10 = vector.load %arg2[%c1_10, %c0_11, %c0_12] : memref<4x16x16xf32, #tpu.memory_space<vmem>>, vector<1x16x16xf32>
    %11 = vector.shape_cast %10 : vector<1x16x16xf32> to vector<16x16xf32>
    %12 = arith.subf %9, %11 : vector<16x16xf32>
    %c2_13 = arith.constant 2 : index
    %c22 = arith.constant 22 : index
    %13 = vector.load %arg5[%c2_13, %c22] : memref<20x80xf32, #tpu.memory_space<vmem>>, vector<16x16xf32>
    tpu.vector_store %arg5[%c2_13, %c22], %12 {strides = array<i32>} : memref<20x80xf32, #tpu.memory_space<vmem>>, vector<16x16xf32>,
    %c2_14 = arith.constant 2 : index
    %c0_15 = arith.constant 0 : index
    %c0_16 = arith.constant 0 : index
    %14 = vector.load %arg1[%c2_14, %c0_15, %c0_16] : memref<4x16x16xf32, #tpu.memory_space<vmem>>, vector<1x16x16xf32>
    %15 = vector.shape_cast %14 : vector<1x16x16xf32> to vector<16x16xf32>
    %c2_17 = arith.constant 2 : index
    %c0_18 = arith.constant 0 : index
    %c0_19 = arith.constant 0 : index
    %16 = vector.load %arg2[%c2_17, %c0_18, %c0_19] : memref<4x16x16xf32, #tpu.memory_space<vmem>>, vector<1x16x16xf32>
    %17 = vector.shape_cast %16 : vector<1x16x16xf32> to vector<16x16xf32>
    %18 = arith.subf %15, %17 : vector<16x16xf32>
    %c2_20 = arith.constant 2 : index
    %c42 = arith.constant 42 : index
    %19 = vector.load %arg5[%c2_20, %c42] : memref<20x80xf32, #tpu.memory_space<vmem>>, vector<16x16xf32>
    tpu.vector_store %arg5[%c2_20, %c42], %18 {strides = array<i32>} : memref<20x80xf32, #tpu.memory_space<vmem>>, vector<16x16xf32>,
    %c3 = arith.constant 3 : index
    %c0_21 = arith.constant 0 : index
    %c0_22 = arith.constant 0 : index
    %20 = vector.load %arg1[%c3, %c0_21, %c0_22] : memref<4x16x16xf32, #tpu.memory_space<vmem>>, vector<1x16x16xf32>
    %21 = vector.shape_cast %20 : vector<1x16x16xf32> to vector<16x16xf32>
    %c3_23 = arith.constant 3 : index
    %c0_24 = arith.constant 0 : index
    %c0_25 = arith.constant 0 : index
    %22 = vector.load %arg2[%c3_23, %c0_24, %c0_25] : memref<4x16x16xf32, #tpu.memory_space<vmem>>, vector<1x16x16xf32>
    %23 = vector.shape_cast %22 : vector<1x16x16xf32> to vector<16x16xf32>
    %24 = arith.subf %21, %23 : vector<16x16xf32>
    %c2_26 = arith.constant 2 : index
    %c62 = arith.constant 62 : index
    %25 = vector.load %arg5[%c2_26, %c62] : memref<20x80xf32, #tpu.memory_space<vmem>>, vector<16x16xf32>
    tpu.vector_store %arg5[%c2_26, %c62], %24 {strides = array<i32>} : memref<20x80xf32, #tpu.memory_space<vmem>>, vector<16x16xf32>,
    %c0_27 = arith.constant 0 : index
    %c0_28 = arith.constant 0 : index
    %26 = vector.load %arg5[%c0_27, %c0_28] : memref<20x80xf32, #tpu.memory_space<vmem>>, vector<20x76xf32>
    %c0_29 = arith.constant 0 : index
    %c1_30 = arith.constant 1 : index
    %27 = vector.load %arg5[%c0_29, %c1_30] : memref<20x80xf32, #tpu.memory_space<vmem>>, vector<20x76xf32>
    %c0_31 = arith.constant 0 : index
    %c2_32 = arith.constant 2 : index
    %28 = vector.load %arg5[%c0_31, %c2_32] : memref<20x80xf32, #tpu.memory_space<vmem>>, vector<20x76xf32>
    %c0_33 = arith.constant 0 : index
    %c3_34 = arith.constant 3 : index
    %29 = vector.load %arg5[%c0_33, %c3_34] : memref<20x80xf32, #tpu.memory_space<vmem>>, vector<20x76xf32>
    %c0_35 = arith.constant 0 : index
    %c4 = arith.constant 4 : index
    %30 = vector.load %arg5[%c0_35, %c4] : memref<20x80xf32, #tpu.memory_space<vmem>>, vector<20x76xf32>
    %31 = arith.addf %26, %30 : vector<20x76xf32>
    %32 = arith.addf %27, %29 : vector<20x76xf32>
    %33 = arith.addf %31, %32 : vector<20x76xf32>
    %34 = arith.addf %33, %28 : vector<20x76xf32>
    %c0_36 = arith.constant 0 : index
    %c0_37 = arith.constant 0 : index
    %35 = vector.load %arg6[%c0_36, %c0_37] : memref<20x76xf32, #tpu.memory_space<vmem>>, vector<20x76xf32>
    tpu.vector_store %arg6[%c0_36, %c0_37], %34 {strides = array<i32>} : memref<20x76xf32, #tpu.memory_space<vmem>>, vector<20x76xf32>,
    %cst_38 = arith.constant 0.0111703351 : f32
    %36 = vector.broadcast %cst_38 : f32 to vector<20x76xf32>
    %37 = arith.mulf %36, %31 : vector<20x76xf32>
    %cst_39 = arith.constant 0.0236475989 : f32
    %38 = vector.broadcast %cst_39 : f32 to vector<20x76xf32>
    %39 = arith.mulf %38, %32 : vector<20x76xf32>
    %40 = arith.addf %37, %39 : vector<20x76xf32>
    %cst_40 = arith.constant 0.0303641204 : f32
    %41 = vector.broadcast %cst_40 : f32 to vector<20x76xf32>
    %42 = arith.mulf %41, %28 : vector<20x76xf32>
    %43 = arith.addf %40, %42 : vector<20x76xf32>
    %c0_41 = arith.constant 0 : index
    %c0_42 = arith.constant 0 : index
    %44 = vector.load %arg7[%c0_41, %c0_42] : memref<20x76xf32, #tpu.memory_space<vmem>>, vector<20x76xf32>
    tpu.vector_store %arg7[%c0_41, %c0_42], %43 {strides = array<i32>} : memref<20x76xf32, #tpu.memory_space<vmem>>, vector<20x76xf32>,
    %c0_43 = arith.constant 0 : index
    %c0_44 = arith.constant 0 : index
    %45 = vector.load %arg6[%c0_43, %c0_44] : memref<20x76xf32, #tpu.memory_space<vmem>>, vector<16x76xf32>
    %c4_45 = arith.constant 4 : index
    %c0_46 = arith.constant 0 : index
    %46 = vector.load %arg6[%c4_45, %c0_46] : memref<20x76xf32, #tpu.memory_space<vmem>>, vector<16x76xf32>
    %47 = arith.addf %45, %46 : vector<16x76xf32>
    %cst_47 = arith.constant 0.0111703351 : f32
    %48 = vector.broadcast %cst_47 : f32 to vector<16x76xf32>
    %49 = arith.mulf %48, %47 : vector<16x76xf32>
    %c1_48 = arith.constant 1 : index
    %c0_49 = arith.constant 0 : index
    %50 = vector.load %arg6[%c1_48, %c0_49] : memref<20x76xf32, #tpu.memory_space<vmem>>, vector<16x76xf32>
    %c3_50 = arith.constant 3 : index
    %c0_51 = arith.constant 0 : index
    %51 = vector.load %arg6[%c3_50, %c0_51] : memref<20x76xf32, #tpu.memory_space<vmem>>, vector<16x76xf32>
    %52 = arith.addf %50, %51 : vector<16x76xf32>
    %cst_52 = arith.constant 0.0236475989 : f32
    %53 = vector.broadcast %cst_52 : f32 to vector<16x76xf32>
    %54 = arith.mulf %53, %52 : vector<16x76xf32>
    %55 = arith.addf %49, %54 : vector<16x76xf32>
    %c2_53 = arith.constant 2 : index
    %c0_54 = arith.constant 0 : index
    %56 = vector.load %arg6[%c2_53, %c0_54] : memref<20x76xf32, #tpu.memory_space<vmem>>, vector<16x76xf32>
    %cst_55 = arith.constant 0.0303641204 : f32
    %57 = vector.broadcast %cst_55 : f32 to vector<16x76xf32>
    %58 = arith.mulf %57, %56 : vector<16x76xf32>
    %59 = arith.addf %55, %58 : vector<16x76xf32>
    %c0_56 = arith.constant 0 : index
    %c0_57 = arith.constant 0 : index
    %60 = vector.load %arg7[%c0_56, %c0_57] : memref<20x76xf32, #tpu.memory_space<vmem>>, vector<16x76xf32>
    %c4_58 = arith.constant 4 : index
    %c0_59 = arith.constant 0 : index
    %61 = vector.load %arg7[%c4_58, %c0_59] : memref<20x76xf32, #tpu.memory_space<vmem>>, vector<16x76xf32>
    %62 = arith.addf %60, %61 : vector<16x76xf32>
    %c1_60 = arith.constant 1 : index
    %c0_61 = arith.constant 0 : index
    %63 = vector.load %arg7[%c1_60, %c0_61] : memref<20x76xf32, #tpu.memory_space<vmem>>, vector<16x76xf32>
    %c3_62 = arith.constant 3 : index
    %c0_63 = arith.constant 0 : index
    %64 = vector.load %arg7[%c3_62, %c0_63] : memref<20x76xf32, #tpu.memory_space<vmem>>, vector<16x76xf32>
    %65 = arith.addf %63, %64 : vector<16x76xf32>
    %66 = arith.addf %62, %65 : vector<16x76xf32>
    %c2_64 = arith.constant 2 : index
    %c0_65 = arith.constant 0 : index
    %67 = vector.load %arg7[%c2_64, %c0_65] : memref<20x76xf32, #tpu.memory_space<vmem>>, vector<16x76xf32>
    %68 = arith.addf %66, %67 : vector<16x76xf32>
    %69 = arith.addf %59, %68 : vector<16x76xf32>
    %c2_66 = arith.constant 2 : index
    %c2_67 = arith.constant 2 : index
    %70 = vector.load %arg5[%c2_66, %c2_67] : memref<20x80xf32, #tpu.memory_space<vmem>>, vector<16x76xf32>
    %71 = arith.subf %70, %69 : vector<16x76xf32>
    %72 = math.absf %71 : vector<16x76xf32>
    %73 = tpu.iota {dimensions = array<i32: 1>} : vector<1x76xi32>
    %c0_i32 = arith.constant 0 : i32
    %74 = vector.broadcast %c0_i32 : i32 to vector<1x76xi32>
    %75 = arith.cmpi slt, %73, %74 : vector<1x76xi32>
    %c0_i32_68 = arith.constant 0 : i32
    %76 = vector.broadcast %c0_i32_68 : i32 to vector<1x76xi32>
    %77 = arith.cmpi sge, %73, %76 : vector<1x76xi32>
    %c16_i32 = arith.constant 16 : i32
    %78 = vector.broadcast %c16_i32 : i32 to vector<1x76xi32>
    %79 = arith.cmpi slt, %73, %78 : vector<1x76xi32>
    %80 = arith.andi %77, %79 : vector<1x76xi1>
    %81 = arith.ori %75, %80 : vector<1x76xi1>
    %c20_i32 = arith.constant 20 : i32
    %82 = vector.broadcast %c20_i32 : i32 to vector<1x76xi32>
    %83 = arith.cmpi sge, %73, %82 : vector<1x76xi32>
    %c36_i32 = arith.constant 36 : i32
    %84 = vector.broadcast %c36_i32 : i32 to vector<1x76xi32>
    %85 = arith.cmpi slt, %73, %84 : vector<1x76xi32>
    %86 = arith.andi %83, %85 : vector<1x76xi1>
    %87 = arith.ori %81, %86 : vector<1x76xi1>
    %c40_i32 = arith.constant 40 : i32
    %88 = vector.broadcast %c40_i32 : i32 to vector<1x76xi32>
    %89 = arith.cmpi sge, %73, %88 : vector<1x76xi32>
    %c56_i32 = arith.constant 56 : i32
    %90 = vector.broadcast %c56_i32 : i32 to vector<1x76xi32>
    %91 = arith.cmpi slt, %73, %90 : vector<1x76xi32>
    %92 = arith.andi %89, %91 : vector<1x76xi1>
    %93 = arith.ori %87, %92 : vector<1x76xi1>
    %c60_i32 = arith.constant 60 : i32
    %94 = vector.broadcast %c60_i32 : i32 to vector<1x76xi32>
    %95 = arith.cmpi sge, %73, %94 : vector<1x76xi32>
    %c76_i32 = arith.constant 76 : i32
    %96 = vector.broadcast %c76_i32 : i32 to vector<1x76xi32>
    %97 = arith.cmpi slt, %73, %96 : vector<1x76xi32>
    %98 = arith.andi %95, %97 : vector<1x76xi1>
    %99 = arith.ori %93, %98 : vector<1x76xi1>
    %cst_69 = arith.constant 0.000000e+00 : f32
    %100 = vector.shape_cast %99 : vector<1x76xi1> to vector<1x76xi1>
    %101 = vector.broadcast %100 : vector<1x76xi1> to vector<16x76xi1>
    %102 = vector.broadcast %cst_69 : f32 to vector<16x76xf32>
    %103 = arith.select %101, %72, %102 : vector<16x76xi1>, vector<16x76xf32>
    %104 = vector.shape_cast %103 : vector<16x76xf32> to vector<1x16x76xf32>
    %cst_70 = arith.constant dense<0.000000e+00> : vector<1xf32>
    %105 = vector.multi_reduction <add>, %104, %cst_70 [1, 2] : vector<1x16x76xf32> to vector<1xf32>
    %106 = vector.shape_cast %105 : vector<1xf32> to vector<1x1x1xf32>
    %107 = vector.extract %106[0, 0, 0] : f32 from vector<1x1x1xf32>
    %108 = math.absf %70 : vector<16x76xf32>
    %109 = vector.shape_cast %108 : vector<16x76xf32> to vector<1x16x76xf32>
    %cst_71 = arith.constant dense<0.000000e+00> : vector<1xf32>
    %110 = vector.multi_reduction <add>, %109, %cst_71 [1, 2] : vector<1x16x76xf32> to vector<1xf32>
    %111 = vector.shape_cast %110 : vector<1xf32> to vector<1x1x1xf32>
    %112 = vector.extract %111[0, 0, 0] : f32 from vector<1x1x1xf32>
    %113 = vector.broadcast %107 : f32 to vector<1x8x128xf32>
    %c0_72 = arith.constant 0 : index
    %c0_73 = arith.constant 0 : index
    %c0_74 = arith.constant 0 : index
    %114 = vector.load %arg3[%c0_72, %c0_73, %c0_74] : memref<1x8x128xf32, #tpu.memory_space<vmem>>, vector<1x8x128xf32>
    tpu.vector_store %arg3[%c0_72, %c0_73, %c0_74], %113 {strides = array<i32>} : memref<1x8x128xf32, #tpu.memory_space<vmem>>, vector<1x8x128xf32>,
    %115 = vector.broadcast %112 : f32 to vector<1x8x128xf32>
    %c0_75 = arith.constant 0 : index
    %c0_76 = arith.constant 0 : index
    %c0_77 = arith.constant 0 : index
    %116 = vector.load %arg4[%c0_75, %c0_76, %c0_77] : memref<1x8x128xf32, #tpu.memory_space<vmem>>, vector<1x8x128xf32>
    tpu.vector_store %arg4[%c0_75, %c0_76, %c0_77], %115 {strides = array<i32>} : memref<1x8x128xf32, #tpu.memory_space<vmem>>, vector<1x8x128xf32>,
    return
  }
  func.func @transform_0(%arg0: i32) -> (i32, i32, i32) {
    %c0_i32 = arith.constant 0 : i32
    %c0_i32_0 = arith.constant 0 : i32
    %c0_i32_1 = arith.constant 0 : i32
    return %arg0, %c0_i32, %c0_i32_0 : i32, i32, i32
  }
  func.func @transform_1(%arg0: i32) -> (i32, i32, i32) {
    %c0_i32 = arith.constant 0 : i32
    %c0_i32_0 = arith.constant 0 : i32
    %c0_i32_1 = arith.constant 0 : i32
    return %arg0, %c0_i32, %c0_i32_0 : i32, i32, i32
  }
  func.func @transform_2(%arg0: i32) -> (i32, i32, i32) {
    %c0_i32 = arith.constant 0 : i32
    %c0_i32_0 = arith.constant 0 : i32
    %c0_i32_1 = arith.constant 0 : i32
    return %arg0, %c0_i32, %c0_i32_0 : i32, i32, i32
  }
  func.func @transform_3(%arg0: i32) -> (i32, i32, i32) {
    %c0_i32 = arith.constant 0 : i32
    %c0_i32_0 = arith.constant 0 : i32
    %c0_i32_1 = arith.constant 0 : i32
    return %arg0, %c0_i32, %c0_i32_0 : i32, i32, i32
  }
}

</mosaic_0001>

<bundles_post_ra>
// kernel: tpu_custom_call.1
= control target key start
LH: loop header
LB: loop body
LE: loop exit
PB: predicated region body
PF: predicated region fallthrough
CT: control target
= control target key end

     0   :  { %9 = vsyncpa [#allocation6], 0  ;;  %s1298_s0 = inlined_call_operand.hbm [shape: f32[8,16,16], index: 0, kind: input, shape index: {}]   ;;  %s1299_s1 = inlined_call_operand.hbm [shape: f32[8,16,16], index: 1, kind: input, shape index: {}]   ;;  %s1300_s2 = inlined_call_operand.hbm [shape: f32[2,8,128], index: 2, kind: output, shape index: {0}]   ;;  %s1301_s3 = inlined_call_operand.hbm [shape: f32[2,8,128], index: 3, kind: output, shape index: {1}]  }
   0x1   :  { %11 = vsyncpa [#allocation6 + $0x1], 0 }
   0x2   :  { %12 = vsyncpa [#allocation9], 0 }
   0x3   :  { %14 = vsyncpa [#allocation9 + $0x1], 0 }
   0x4   :  { %15 = vsyncpa [#allocation7], 0 }
   0x5   :  { %17 = vsyncpa [#allocation7 + $0x1], 0 }
   0x6   :  { %18 = vsyncpa [#allocation12], 0 }
   0x7   :  { %20 = vsyncpa [#allocation12 + $0x1], 0  ;;  %s1002_s12 = smov 0   ;;  %s1004_s13 = smov 0  }
   0x8   :  { %s1006_s14 = smov 0   ;;  %s1008_s15 = smov 0  }
   0x9 LB: > { %s1023_s16 = sadd.s32 4294967295, %s965_s15   ;;  %s702_s17 = sadd.s32 4294967294, %s965_s15   ;;  %s965_s15 = sphi %s1008_s15, %s1317_s15   ;;  %s961_s14 = sphi %s1006_s14, %s1316_s14   ;;  %s957_s13 = sphi %s1004_s13, %s1315_s13   ;;  %s953_s12 = sphi %s1002_s12, %s1314_s12  }
   0xa   : > { %s1027_s18 = sadd.s32 1, %s965_s15   ;;  %s33_s19 = sadd.s32 1, %s961_s14 }
   0xb   : > { %s30_s20 = ssub.s32 %s965_s15, %s1027_s18  ;;  %p40_p0 = scmp.ne.s32.totalorder %s961_s14, %s957_s13 }
   0xc   : > { %p31_p1 = scmp.eq.s32.totalorder %s30_s20, 0  ;;  %p41_p2 = scmp.eq.s32.totalorder %s965_s15, 0 }
   0xd   : > { %p46_p3 = scmp.ne.s32.totalorder %s957_s13, %s953_s12  ;;  %p47_p4 = scmp.eq.s32.totalorder %s1023_s16, 0 }
   0xe   : > { %s1039_s21 = scalar_select %p31_p1, %s961_s14, %s33_s19  }
   0xf   : > { %p1041_p5 = por %p41_p2, %p40_p0  ;;  %p1045_p6 = por %p47_p4, %p46_p3 }
  0x10   : > { %p96_p7 = scmp.eq.s32.totalorder %s1023_s16, 1  ;;  %p102_p8 = scmp.eq.s32.totalorder %s702_s17, 1 }
  0x11   : > { %s1305_s23 = scalar_select %p1045_p6, 1, 0 }
  0x12   : > { %p766_p10 = scmp.lt.s32.totalorder %s965_s15, 2  ;;  %p1052_p11 = por %p96_p7, %p40_p0 }
  0x13   : > { %p1056_p12 = por %p102_p8, %p46_p3  ;;  %s1061_s26 = sand.u32 1, %s961_s14  }
  0x14   : > { %s1306_s24 = scalar_select %p1052_p11, 1, 0 }
  0x15   : > { %s1307_s25 = scalar_select %p1056_p12, 1, 0 }
  0x16   : > { %s737_s27 = sshll.u32 %s965_s15, 10  ;;  %s705_s28 = sshll.u32 %s1061_s26, 6 }
  0x17   : > { %s1070_s4 = scalar_lea.hbm %s1298_s0, %s737_s27  ;;  %s152_s5 = scalar_lea.vmem [#allocation5], %s705_s28 }
  0x18   : > { %s160_s6 = sshll.u32 %s152_s5, 4  ;;  %p1076_p13 = pnand %p766_p10, %p1041_p5  ;;  %s1080_s6 = int_to_ptr.vmem [resolvable:$true] %s160_s6 }
  0x19   : > { %s149_s8 = scalar_lea.sflag [#allocation6], %s1061_s26  ;;  %s811_s9 = scalar_lea.hbm %s1070_s4, 1024 }
  0x1a   : > { %p812_p0 = scmp.ne.s32.totalorder %s1070_s4, %s811_s9  ;;  %p813_p1 = pneg %p1076_p13 }
  0x1b   : > { %s816_s17 = scalar_lea.hbm %s1298_s0, 2048  ;;  %p817_p4 = scmp.lt.s32.totalorder %s1070_s4, %s1298_s0 }
  0x1c   : > { %p814_p2 = pnand %p813_p1, %p812_p0  ;;  %p818_p5 = scmp.lt.s32.totalorder %s816_s17, %s811_s9 }
  0x1e   : > { %p815_p3 = pneg %p814_p2  ;;  %p819_p7 = por %p818_p5, %p817_p4 }
  0x20   : > { %p820_p8 = pnand %p819_p7, %p815_p3 }
  0x22   : > { %823 = shalt.err (!%p820_p8)
}
  0x23   : > { %s824_s22 = scalar_lea.vmem %s1080_s6, 1024  ;;  %s967_s29 = smov [#allocation5]  }
  0x24   : > { %p825_p10 = scmp.ne.s32.totalorder %s1080_s6, %s824_s22  ;;  %s829_s30 = sshll.u32 %s967_s29, 4  ;;  %s830_s30 = int_to_ptr.vmem [resolvable:$false] %s829_s30 }
  0x25   : > { %s831_s5 = scalar_lea.vmem %s830_s30, 2048  ;;  %p832_p9 = scmp.lt.s32.totalorder %s1080_s6, %s830_s30 }
  0x26   : > { %p827_p0 = pnand %p825_p10, %p813_p1  ;;  %p833_p12 = scmp.lt.s32.totalorder %s831_s5, %s824_s22 }
  0x28   : > { %p828_p2 = pneg %p827_p0  ;;  %p834_p11 = por %p833_p12, %p832_p9 }
  0x2a   : > { %p835_p4 = pnand %p834_p11, %p828_p2 }
  0x2c   : > { %838 = shalt.err (!%p835_p4)
}
  0x2d   : > { %s968_s9 = smov 128   ;;  %s969_s10 = smov 8  }
  0x2e   : > { %755 = dma.hbm_to_vmem [thread:$0]  (!%p1076_p13), %s1070_s4, 1024, %s1080_s6, %s149_s8, %s968_s9, %s968_s9, %s969_s10  }
  0x2f   : > { %p713_p9 = scmp.ge.s32.totalorder %s965_s15, 1  ;;  %p190_p11 = scmp.lt.s32.totalorder %s965_s15, 3 }
  0x30   : > { %s1123_s20 = scalar_lea.hbm %s1299_s1, %s737_s27  ;;  %s174_s22 = scalar_lea.vmem [#allocation8], %s705_s28 }
  0x31   : > { %p1114_p12 = pnand %p713_p9, %p190_p11  ;;  %s182_s29 = sshll.u32 %s174_s22, 4  ;;  %s1127_s29 = int_to_ptr.vmem [resolvable:$true] %s182_s29 }
  0x32   : > { %s171_s4 = scalar_lea.sflag [#allocation9], %s1061_s26  ;;  %s839_s6 = scalar_lea.hbm %s1123_s20, 1024 }
  0x33   : > { %p840_p3 = scmp.ne.s32.totalorder %s1123_s20, %s839_s6  ;;  %s844_s27 = scalar_lea.hbm %s1299_s1, 2048 }
  0x34   : > { %p845_p8 = scmp.lt.s32.totalorder %s1123_s20, %s1299_s1  ;;  %p846_p10 = scmp.lt.s32.totalorder %s844_s27, %s839_s6 }
  0x35   : > { %p842_p5 = pnand %p840_p3, %p813_p1 }
  0x36   : > { %p847_p0 = por %p846_p10, %p845_p8 }
  0x37   : > { %p843_p7 = pneg %p842_p5 }
  0x39   : > { %p848_p2 = pnand %p847_p0, %p843_p7 }
  0x3b   : > { %851 = shalt.err (!%p848_p2)
}
  0x3c   : > { %s852_s26 = scalar_lea.vmem %s1127_s29, 1024  ;;  %s970_s28 = smov [#allocation8]  }
  0x3d   : > { %p853_p4 = scmp.ne.s32.totalorder %s1127_s29, %s852_s26  ;;  %s857_s19 = sshll.u32 %s970_s28, 4  ;;  %s858_s19 = int_to_ptr.vmem [resolvable:$false] %s857_s19 }
  0x3e   : > { %s859_s22 = scalar_lea.vmem %s858_s19, 2048  ;;  %p860_p3 = scmp.lt.s32.totalorder %s1127_s29, %s858_s19 }
  0x3f   : > { %p855_p9 = pnand %p853_p4, %p813_p1  ;;  %p861_p5 = scmp.lt.s32.totalorder %s859_s22, %s852_s26 }
  0x41   : > { %p856_p11 = pneg %p855_p9  ;;  %p862_p6 = por %p861_p5, %p860_p3 }
  0x43   : > { %p863_p8 = pnand %p862_p6, %p856_p11 }
  0x45   : > { %866 = shalt.err (!%p863_p8)
}
  0x46   : > { %758 = dma.hbm_to_vmem [thread:$0]  (!%p1076_p13), %s1123_s20, 1024, %s1127_s29, %s171_s4, %s968_s9, %s968_s9, %s969_s10  }
  0x47   : > { %194 = sbr.rel (%p1114_p12) target bundleno = 960 (0x3c0), region = 28  ;;  %s1158_s6 = sand.u32 (!%p1114_p12), 1, %s957_s13  }
  0x48   : > { %s714_s8 = sshll.u32 (!%p1114_p12), %s1158_s6, 6  ;;  %s197_s30 = scalar_lea.sflag (!%p1114_p12), [#allocation6], %s1158_s6 }
  0x49   : > { %s1162_s27 = scalar_lea.vmem (!%p1114_p12), [#allocation5], %s714_s8  ;;  %p1310_p6 = scmp.ne.s32.totalorder (!%p1114_p12), %s1305_s23, 0 }
  0x4c   : > { %936 = dma.done.wait (%p1310_p6), %s197_s30, 1024  }
  0x4d   : > { %938 = vsyncadd (%p1310_p6), %s197_s30, 4294966272  ;;  %s206_s7 = scalar_lea.sflag [#allocation9], %s1158_s6  ;;  %s1169_s9 = scalar_lea.vmem [#allocation8], %s714_s8 }
  0x4e   : > { %940 = dma.done.wait (%p1310_p6), %s206_s7, 1024  }
  0x4f   : > { %942 = vsyncadd (%p1310_p6), %s206_s7, 4294966272  ;;  %vm244_vm0 = vcmask 654336   ;;  %v971_v0 = vmov 0.0   ;;  %vm247_vm1 = vcmask 650240   ;;  %v718_v1 = vld [vmem:[%s1162_s27 + $0x10] sm:$0xff]  ;;  %v249_v3 = vld [vmem:[%s1162_s27] sm:$0xff] }
  0x50   : > { %245 = vst.msk [vmem:[#allocation2] sm:$0xff] %vm244_vm0, %v971_v0  ;;  %246 = vst.msk [vmem:[#allocation2 + $0x8] sm:$0xff] %vm244_vm0, %v971_v0  ;;  %v720_v2 = vld [vmem:[%s1169_s9 + $0x10] sm:$0xff]  ;;  %v251_v5 = vld [vmem:[%s1169_s9] sm:$0xff]  ;;  %s972_s23 = smov 22   ;;  %s973_s10 = smov 2  }
  0x51   : > { %248 = vst.msk [vmem:[#allocation2 + $0x10] sm:$0xf] %vm247_vm1, %v971_v0  ;;  %v272_v4 = vsub.f32 %v718_v1, %v720_v2  ;;  %v719_v6 = vld [vmem:[%s1162_s27 + $0x18] sm:$0xff]  ;;  %v253_v8 = vsub.f32 %v249_v3, %v251_v5  ;;  %v250_v9 = vld [vmem:[%s1162_s27 + $0x8] sm:$0xff]  ;;  %v722_v15 = vld [vmem:[%s1162_s27 + $0x20] sm:$0xff]  ;;  %s974_s11 = smov 42  }
  0x52   : > { %v721_v7 = vld [vmem:[%s1169_s9 + $0x18] sm:$0xff]  ;;  %v252_v10 = vld [vmem:[%s1169_s9 + $0x8] sm:$0xff]  ;;  %v724_v16 = vld [vmem:[%s1169_s9 + $0x20] sm:$0xff]  ;;  %s975_s20 = smov 62   ;;  %vm263_vm2 = vcmask 146448   ;;  %vm282_vm3 = vcmask 310448  }
  0x53   : > { %276 = vrot.lane.b32.xlu1 %v272_v4, %s972_s23  ;;  %v273_v11 = vsub.f32 %v719_v6, %v721_v7  ;;  %257 = vrot.lane.b32.xlu0 %v253_v8, %s973_s10  ;;  %v254_v12 = vsub.f32 %v250_v9, %v252_v10  ;;  %v723_v13 = vld [vmem:[%s1162_s27 + $0x28] sm:$0xff]  ;;  %v291_v18 = vsub.f32 %v722_v15, %v724_v16  ;;  %v727_v19 = vld [vmem:[%s1162_s27 + $0x38] sm:$0xff]  ;;  %vm301_vm4 = vcmask 474448   ;;  %s976_s29 = smov 126   ;;  %s977_s4 = smov 124  }
  0x54   : > { %v725_v14 = vld [vmem:[%s1169_s9 + $0x28] sm:$0xff]  ;;  %v729_v20 = vld [vmem:[%s1169_s9 + $0x38] sm:$0xff]  ;;  %v726_v21 = vld [vmem:[%s1162_s27 + $0x30] sm:$0xff]  ;;  %vm320_vm5 = vcmask 638448   ;;  %s978_s5 = smov 127   ;;  %vm371_vm6 = vcmask 621568  }
  0x55   : > { %v292_v17 = vsub.f32 %v723_v13, %v725_v14  ;;  %v728_v22 = vld [vmem:[%s1169_s9 + $0x30] sm:$0xff]  ;;  %v311_v23 = vsub.f32 %v727_v19, %v729_v20  ;;  %vm374_vm7 = vcmask 617472   ;;  %s716_s17 = sshll.u32 %s1158_s6, 3  ;;  %s732_s26 = sshll.u32 %s1023_s16, 7 }
  0x56   : > { %v310_v24 = vsub.f32 %v726_v21, %v728_v22  ;;  %s234_s28 = scalar_lea.vmem [#allocation10], %s716_s17  ;;  %s1217_s22 = scalar_lea.vmem [#allocation11], %s716_s17 }
  0x57   : > { %278 = vrot.lane.b32.xlu1 %v273_v11, %s972_s23  ;;  %259 = vrot.lane.b32.xlu0 %v254_v12, %s973_s10  ;;  %s564_s19 = sshll.u32 %s234_s28, 4  ;;  %s577_s8 = sshll.u32 %s1217_s22, 4  ;;  %s1225_s19 = int_to_ptr.vmem [resolvable:$true] %s564_s19  ;;  %s1227_s8 = int_to_ptr.vmem [resolvable:$true] %s577_s8 }
  0x58   : > { %s1223_s9 = scalar_lea.hbm %s1300_s2, %s732_s26  ;;  %p1311_p1 = scmp.ne.s32.totalorder %s1306_s24, 0 }
  0x5b   : > { %297 = vrot.lane.b32.xlu1 %v292_v17, %s974_s11  ;;  %295 = vrot.lane.b32.xlu0 %v291_v18, %s974_s11  ;;  %s1234_s11 = scalar_lea.hbm %s1301_s3, %s732_s26 }
  0x5f   : > { %316 = vrot.lane.b32.xlu1 %v311_v23, %s975_s20  ;;  %314 = vrot.lane.b32.xlu0 %v310_v24, %s975_s20  ;;  %s546_s20 = scalar_lea.sflag [#allocation7], %s1158_s6 }
  0xc5   : > { %v277_v25 = vpop.permute.xlu1 %276  ;;  %v258_v26 = vpop.permute.xlu0 %257 }
  0xc6   : > { %264 = vst.msk [vmem:[#allocation2 + $0x2] sm:$0xff] %vm263_vm2, %v258_v26 }
  0xc7   : > { %283 = vst.msk [vmem:[#allocation2 + $0x2] sm:$0xff] %vm282_vm3, %v277_v25 }
  0xc9   : > { %v279_v27 = vpop.permute.xlu1 %278  ;;  %v260_v28 = vpop.permute.xlu0 %259 }
  0xca   : > { %265 = vst.msk [vmem:[#allocation2 + $0xa] sm:$0xff] %vm263_vm2, %v260_v28 }
  0xcb   : > { %284 = vst.msk [vmem:[#allocation2 + $0xa] sm:$0xff] %vm282_vm3, %v279_v27 }
  0xcd   : > { %v298_v29 = vpop.permute.xlu1 %297  ;;  %v296_v30 = vpop.permute.xlu0 %295 }
  0xce   : > { %303 = vst.msk [vmem:[#allocation2 + $0xa] sm:$0xff] %vm301_vm4, %v298_v29  ;;  %302 = vst.msk [vmem:[#allocation2 + $0x2] sm:$0xff] %vm301_vm4, %v296_v30 }
  0xd1   : > { %v317_v31 = vpop.permute.xlu1 %316  ;;  %v315_v32 = vpop.permute.xlu0 %314 }
  0xd2   : > { %322 = vst.msk [vmem:[#allocation2 + $0xa] sm:$0xff] %vm320_vm5, %v317_v31  ;;  %321 = vst.msk [vmem:[#allocation2 + $0x2] sm:$0xff] %vm320_vm5, %v315_v32 }
  0xd9   : > { %v324_v33 = vld [vmem:[#allocation2 + $0x8] sm:$0xff]  ;;  %v323_v34 = vld [vmem:[#allocation2] sm:$0xff]  ;;  %v325_v35 = vld [vmem:[#allocation2 + $0x10] sm:$0xf] }
  0xda   : > { %343 = vrot.lane.b32.xlu1 %v324_v33, %s976_s29  ;;  %341 = vrot.lane.b32.xlu0 %v323_v34, %s976_s29  ;;  %v397_v36 = vmul.f32 0.03036412, %v323_v34  ;;  %v398_v46 = vmul.f32 0.03036412, %v324_v33  ;;  %v399_v47 = vmul.f32 0.03036412, %v325_v35 }
  0xde   : > { %329 = vrot.lane.b32.xlu1 %v323_v34, %s977_s4  ;;  %345 = vrot.lane.b32.xlu0 %v325_v35, %s976_s29 }
  0xe2   : > { %333 = vrot.lane.b32.xlu1 %v325_v35, %s977_s4  ;;  %331 = vrot.lane.b32.xlu0 %v324_v33, %s977_s4  ;;  %s980_s4 = smov [#allocation10]  }
  0xe6   : > { %403 = vrot.lane.b32.xlu0 %v397_v36, %s976_s29 }
 0x14c   : > { %v344_v37 = vpop.permute.xlu1 %343  ;;  %v342_v38 = vpop.permute.xlu0 %341 }
 0x14d   : > { %v351_v39 = vadd.f32 %v344_v37, %v324_v33  ;;  %v350_v40 = vadd.f32 %v342_v38, %v323_v34 }
 0x14f   : > { %358 = vrot.lane.b32.xlu1 %v351_v39, %s978_s5  ;;  %356 = vrot.lane.b32.xlu0 %v350_v40, %s978_s5  ;;  %v379_v42 = vmul.f32 0.023647599, %v350_v40  ;;  %v380_v44 = vmul.f32 0.023647599, %v351_v39 }
 0x150   : > { %v346_v41 = vpop.permute.xlu0 %345  ;;  %v330_v48 = vpop.permute.xlu1 %329 }
 0x151   : > { %v352_v43 = vadd.f32 %v346_v41, %v325_v35  ;;  %v338_v52 = vadd.f32 %v330_v48, %v323_v34 }
 0x153   : > { %385 = vrot.lane.b32.xlu1 %v379_v42, %s978_s5  ;;  %360 = vrot.lane.b32.xlu0 %v352_v43, %s978_s5  ;;  %v381_v45 = vmul.f32 0.023647599, %v352_v43  ;;  %v376_v61 = vmul.f32 0.011170335, %v338_v52 }
 0x154   : > { %v332_v49 = vpop.permute.xlu0 %331  ;;  %v334_v50 = vpop.permute.xlu1 %333 }
 0x155   : > { %v339_v53 = vadd.f32 %v332_v49, %v324_v33  ;;  %v340_v58 = vadd.f32 %v334_v50, %v325_v35 }
 0x157   : > { %389 = vrot.lane.b32.xlu1 %v381_v45, %s978_s5  ;;  %387 = vrot.lane.b32.xlu0 %v380_v44, %s978_s5  ;;  %v378_v6 = vmul.f32 0.011170335, %v340_v58  ;;  %v377_v7 = vmul.f32 0.011170335, %v339_v53  ;;  %s871_s5 = sshll.u32 %s980_s4, 4  ;;  %s872_s5 = int_to_ptr.vmem [resolvable:$false] %s871_s5 }
 0x158   : > { %v404_v51 = vpop.permute.xlu0 %403  ;;  %s873_s17 = scalar_lea.vmem %s872_s5, 256  ;;  %p874_p10 = scmp.lt.s32.totalorder %s1225_s19, %s872_s5 }
 0x15b   : > { %405 = vrot.lane.b32.xlu1 %v398_v46, %s976_s29  ;;  %407 = vrot.lane.b32.xlu0 %v399_v47, %s976_s29 }
 0x1c1   : > { %v359_v54 = vpop.permute.xlu1 %358  ;;  %v357_v55 = vpop.permute.xlu0 %356 }
 0x1c2   : > { %v366_v56 = vadd.f32 %v359_v54, %v339_v53  ;;  %v365_v57 = vadd.f32 %v357_v55, %v338_v52 }
 0x1c4   : > { %v369_v59 = vadd.f32 %v366_v56, %v344_v37  ;;  %v368_v60 = vadd.f32 %v365_v57, %v342_v38 }
 0x1c5   : > { %v386_v62 = vpop.permute.xlu1 %385  ;;  %v361_v63 = vpop.permute.xlu0 %360 }
 0x1c6   : > { %373 = vst.msk [vmem:[#allocation3 + $0x8] sm:$0xff] %vm371_vm6, %v369_v59  ;;  %372 = vst.msk [vmem:[#allocation3] sm:$0xff] %vm371_vm6, %v368_v60  ;;  %v394_v0 = vadd.f32 %v386_v62, %v376_v61  ;;  %v367_v1 = vadd.f32 %v361_v63, %v340_v58  ;;  %v462_v58 = vld [vmem:[#allocation2 + $0x2] sm:$0xff]  ;;  %v463_v61 = vld [vmem:[#allocation2 + $0xa] sm:$0xff] }
 0x1c8   : > { %v412_v2 = vadd.f32 %v404_v51, %v394_v0  ;;  %v370_v3 = vadd.f32 %v367_v1, %v346_v41 }
 0x1c9   : > { %v390_v4 = vpop.permute.xlu1 %389  ;;  %v388_v5 = vpop.permute.xlu0 %387 }
 0x1ca   : > { %415 = vst.msk [vmem:[#allocation4] sm:$0xff] %vm371_vm6, %v412_v2  ;;  %v396_v8 = vadd.f32 %v390_v4, %v378_v6  ;;  %v395_v9 = vadd.f32 %v388_v5, %v377_v7  ;;  %v519_v2 = vand.u32 2147483647, %v462_v58  ;;  %v476_v4 = vlaneseq }
 0x1cb   : > { %375 = vst.msk [vmem:[#allocation3 + $0x10] sm:$0xf] %vm374_vm7, %v370_v3  ;;  %v520_v3 = vand.u32 2147483647, %v463_v61  ;;  %v979_v6 = vmov 0  }
 0x1cc   : > { %v477_v5 = vand.u32 127, %v476_v4 }
 0x1cd   : > { %v406_v10 = vpop.permute.xlu1 %405  ;;  %v408_v11 = vpop.permute.xlu0 %407  ;;  %v418_v12 = vld [vmem:[#allocation3] sm:$0xff]  ;;  %v419_v20 = vld [vmem:[#allocation3 + $0x8] sm:$0xff] }
 0x1ce   : > { %v420_v13 = vld [vmem:[#allocation3 + $0x4] sm:$0xff]  ;;  %v413_v15 = vadd.f32 %v406_v10, %v395_v9  ;;  %v414_v16 = vadd.f32 %v408_v11, %v396_v8  ;;  %vm483_vm8 = vcmp.ge.s32.totalorder %v477_v5, 20  ;;  %vm484_vm9 = vcmp.lt.s32.totalorder %v477_v5, 36 }
 0x1cf   : > { %v426_v14 = vld [vmem:[#allocation3 + $0x1] sm:$0xff]  ;;  %v422_v18 = vadd.f32 %v420_v13, %v418_v12  ;;  %vm480_vm10 = vcmp.lt.s32.totalorder %v477_v5, 16  ;;  %vm485_vm11 = vmand %vm483_vm8, %vm484_vm9  ;;  %vm487_vm12 = vcmp.ge.s32.totalorder %v477_v5, 40  ;;  %vm488_vm13 = vcmp.lt.s32.totalorder %v477_v5, 56 }
 0x1d0   : > { %v428_v17 = vld [vmem:[#allocation3 + $0x3] sm:$0xff]  ;;  %416 = vst.msk [vmem:[#allocation4 + $0x8] sm:$0xff] %vm371_vm6, %v413_v15  ;;  %vm486_vm14 = vmor %vm480_vm10, %vm485_vm11  ;;  %vm491_vm0 = vcmp.ge.s32.totalorder %v477_v5, 60  ;;  %vm492_vm1 = vcmp.lt.s32.totalorder %v477_v5, 76 }
 0x1d1   : > { %417 = vst.msk [vmem:[#allocation4 + $0x10] sm:$0xf] %vm374_vm7, %v414_v16  ;;  %v430_v19 = vadd.f32 %v428_v17, %v426_v14  ;;  %v424_v26 = vmul.f32 0.011170335, %v422_v18  ;;  %v436_v28 = vld [vmem:[#allocation3 + $0x2] sm:$0xff]  ;;  %v442_v29 = vld [vmem:[#allocation4] sm:$0xff]  ;;  %vm489_vm15 = vmand %vm487_vm12, %vm488_vm13 }
 0x1d2   : > { %v421_v21 = vld [vmem:[#allocation3 + $0xc] sm:$0xff]  ;;  %v438_v44 = vmul.f32 0.03036412, %v436_v28  ;;  %vm490_vm2 = vmor %vm486_vm14, %vm489_vm15 }
 0x1d3   : > { %v427_v22 = vld [vmem:[#allocation3 + $0x9] sm:$0xff]  ;;  %v423_v23 = vadd.f32 %v421_v21, %v419_v20  ;;  %v432_v27 = vmul.f32 0.023647599, %v430_v19  ;;  %vm493_vm3 = vmand %vm491_vm0, %vm492_vm1 }
 0x1d4   : > { %v429_v24 = vld [vmem:[#allocation3 + $0xb] sm:$0xff]  ;;  %vm494_vm4 = vmor %vm490_vm2, %vm493_vm3 }
 0x1d5   : > { %v431_v25 = vadd.f32 %v429_v24, %v427_v22  ;;  %v425_v30 = vmul.f32 0.011170335, %v423_v23  ;;  %v434_v35 = vadd.f32 %v432_v27, %v424_v26  ;;  %v437_v40 = vld [vmem:[#allocation3 + $0xa] sm:$0xff]  ;;  %v495_v7 = vsel %vm494_vm4, 1, %v979_v6 }
 0x1d6   : > { %v439_v51 = vmul.f32 0.03036412, %v437_v40  ;;  %vm496_vm5 = vcmp.eq.s32.totalorder %v495_v7, 1 }
 0x1d7   : > { %v433_v31 = vmul.f32 0.023647599, %v431_v25  ;;  %v444_v32 = vld [vmem:[#allocation4 + $0x4] sm:$0xff]  ;;  %v440_v49 = vadd.f32 %v438_v44, %v434_v35 }
 0x1d8   : > { %v448_v33 = vld [vmem:[#allocation4 + $0x1] sm:$0xff]  ;;  %v446_v36 = vadd.f32 %v444_v32, %v442_v29  ;;  %v445_v39 = vld [vmem:[#allocation4 + $0xc] sm:$0xff] }
 0x1d9   : > { %v450_v34 = vld [vmem:[#allocation4 + $0x3] sm:$0xff]  ;;  %v451_v43 = vld [vmem:[#allocation4 + $0xb] sm:$0xff]  ;;  %v435_v46 = vadd.f32 %v433_v31, %v425_v30 }
 0x1da   : > { %v452_v37 = vadd.f32 %v450_v34, %v448_v33  ;;  %v443_v38 = vld [vmem:[#allocation4 + $0x8] sm:$0xff] }
 0x1db   : > { %v447_v41 = vadd.f32 %v445_v39, %v443_v38  ;;  %v449_v42 = vld [vmem:[#allocation4 + $0x9] sm:$0xff]  ;;  %v441_v55 = vadd.f32 %v439_v51, %v435_v46 }
 0x1dc   : > { %v454_v45 = vadd.f32 %v452_v37, %v446_v36  ;;  %v453_v47 = vadd.f32 %v451_v43, %v449_v42  ;;  %v456_v48 = vld [vmem:[#allocation4 + $0x2] sm:$0xff]  ;;  %v457_v53 = vld [vmem:[#allocation4 + $0xa] sm:$0xff] }
 0x1de   : > { %v458_v50 = vadd.f32 %v456_v48, %v454_v45  ;;  %v455_v52 = vadd.f32 %v453_v47, %v447_v41 }
 0x1e0   : > { %v460_v54 = vadd.f32 %v458_v50, %v440_v49  ;;  %v459_v56 = vadd.f32 %v457_v53, %v455_v52 }
 0x1e2   : > { %466 = vrot.lane.b32.xlu1 %v460_v54, %s973_s10  ;;  %v461_v57 = vadd.f32 %v459_v56, %v441_v55 }
 0x1e4   : > { %468 = vrot.lane.b32.xlu0 %v461_v57, %s973_s10 }
 0x254   : > { %v467_v59 = vpop.permute.xlu1 %466 }
 0x255   : > { %v472_v60 = vsub.f32 %v462_v58, %v467_v59 }
 0x256   : > { %v469_v62 = vpop.permute.xlu0 %468 }
 0x257   : > { %v474_v63 = vand.u32 2147483647, %v472_v60  ;;  %v473_v0 = vsub.f32 %v463_v61, %v469_v62 }
 0x259   : > { %v475_v1 = vand.u32 2147483647, %v473_v0  ;;  %499 = vrot.lane.b32.xlu1 %v474_v63, %s976_s29 }
 0x25b   : > { %501 = vrot.lane.b32.xlu0 %v475_v1, %s976_s29 }
 0x25d   : > { %523 = vrot.lane.b32.xlu1 %v519_v2, %s976_s29 }
 0x25f   : > { %525 = vrot.lane.b32.xlu0 %v520_v3, %s976_s29  ;;  %s867_s29 = scalar_lea.vmem %s1225_s19, 128 }
 0x260   : > { %p868_p13 = scmp.ne.s32.totalorder %s1225_s19, %s867_s29  ;;  %p875_p0 = scmp.lt.s32.totalorder %s873_s17, %s867_s29 }
 0x262   : > { %p869_p12 = pnand %p868_p13, %p1311_p1  ;;  %p876_p2 = por %p875_p0, %p874_p10 }
 0x264   : > { %p870_p7 = pneg %p869_p12 }
 0x266   : > { %p877_p4 = pnand %p876_p2, %p870_p7 }
 0x2cb   : > { %v500_v8 = vpop.permute.xlu1 %499 }
 0x2cc   : > { %v505_v9 = vsel %vm496_vm5, %v500_v8, 0.0 }
 0x2cd   : > { %v507_v10 = vsel %vm371_vm6, %v505_v9, 0.0  ;;  %v502_v11 = vpop.permute.xlu0 %501 }
 0x2ce   : > { %v506_v12 = vsel %vm496_vm5, %v502_v11, 0.0 }
 0x2cf   : > { %v508_v13 = vsel %vm371_vm6, %v506_v12, 0.0  ;;  %v524_v14 = vpop.permute.xlu1 %523 }
 0x2d0   : > { %v529_v15 = vsel %vm371_vm6, %v524_v14, 0.0  ;;  %v509_v16 = vadd.f32 %v508_v13, %v507_v10 }
 0x2d1   : > { %v526_v17 = vpop.permute.xlu0 %525 }
 0x2d2   : > { %v530_v18 = vsel %vm371_vm6, %v526_v17, 0.0  ;;  %510 = vadd.xlane.f32.xlu1 %v509_v16 }
 0x2d3   : > { %v531_v19 = vadd.f32 %v530_v18, %v529_v15 }
 0x2d5   : > { %532 = vadd.xlane.f32.xlu0 %v531_v19 }
 0x35b   : > { %v511_v20 = vpop.xlane.xlu1 %510 }
 0x35c   : > { %v512_v21 = vrot.slane %v511_v20, 4 }
 0x35e   : > { %v513_v22 = vadd.f32 %v512_v21, %v511_v20  ;;  %v533_v23 = vpop.xlane.xlu0 %532 }
 0x35f   : > { %v534_v24 = vrot.slane %v533_v23, 4 }
 0x360   : > { %v514_v25 = vrot.slane %v513_v22, 2 }
 0x361   : > { %v535_v26 = vadd.f32 %v534_v24, %v533_v23 }
 0x362   : > { %v515_v27 = vadd.f32 %v514_v25, %v513_v22 }
 0x363   : > { %v536_v28 = vrot.slane %v535_v26, 2 }
 0x364   : > { %v516_v29 = vrot.slane %v515_v27, 1 }
 0x365   : > { %v537_v30 = vadd.f32 %v536_v28, %v535_v26 }
 0x366   : > { %v517_v31 = vadd.f32 %v516_v29, %v515_v27 }
 0x367   : > { %v538_v32 = vrot.slane %v537_v30, 1 }
 0x368   : > { %740 = vpush %v517_v31 }
 0x369   : > { %v539_v33 = vadd.f32 %v538_v32, %v537_v30 }
 0x36b   : > { %742 = vpush %v539_v33 }
 0x399   : > { %s741_s30 = spop %740 }
 0x39a   : > { %v541_v34 = vstv %s741_s30 }
 0x39b   : > { %542 = vst [vmem:[%s234_s28] sm:$0xff] %v541_v34 }
 0x39c   : > { %s1229_s16 = spop %742 }
 0x39d   : > { %v543_v35 = vstv %s1229_s16 }
 0x39e   : > { %880 = shalt.err (!%p877_p4)
}
 0x39f   : > { %s881_s26 = scalar_lea.hbm %s1223_s9, 128  ;;  %s885_s27 = scalar_lea.hbm %s1300_s2, 256 }
 0x3a0   : > { %p882_p9 = scmp.ne.s32.totalorder %s1223_s9, %s881_s26  ;;  %p886_p5 = scmp.lt.s32.totalorder %s1223_s9, %s1300_s2 }
 0x3a1   : > { %p887_p8 = scmp.lt.s32.totalorder %s885_s27, %s881_s26 }
 0x3a2   : > { %p883_p11 = pnand %p882_p9, %p1311_p1 }
 0x3a3   : > { %p888_p6 = por %p887_p8, %p886_p5 }
 0x3a4   : > { %p884_p3 = pneg %p883_p11 }
 0x3a6   : > { %p889_p13 = pnand %p888_p6, %p884_p3 }
 0x3a8   : > { %892 = shalt.err (!%p889_p13)
}
 0x3a9   : > { %748 = dma.vmem_to_hbm [thread:$0]  (%p1311_p1), %s1225_s19, 128, %s1223_s9, %s546_s20   ;;  %544 = vst [vmem:[%s1217_s22] sm:$0xff] %v543_v35 }
 0x3aa   : > { %s551_s23 = scalar_lea.sflag [#allocation12], %s1158_s6  ;;  %s893_s10 = scalar_lea.vmem %s1227_s8, 128 }
 0x3ab   : > { %p894_p12 = scmp.ne.s32.totalorder %s1227_s8, %s893_s10  ;;  %s981_s29 = smov [#allocation11]  }
 0x3ac   : > { %s897_s4 = sshll.u32 %s981_s29, 4  ;;  %s898_s4 = int_to_ptr.vmem [resolvable:$false] %s897_s4 }
 0x3ad   : > { %p895_p7 = pnand %p894_p12, %p1311_p1  ;;  %s899_s5 = scalar_lea.vmem %s898_s4, 256 }
 0x3ae   : > { %p900_p0 = scmp.lt.s32.totalorder %s1227_s8, %s898_s4  ;;  %p901_p2 = scmp.lt.s32.totalorder %s899_s5, %s893_s10 }
 0x3af   : > { %p896_p10 = pneg %p895_p7 }
 0x3b0   : > { %p902_p4 = por %p901_p2, %p900_p0 }
 0x3b2   : > { %p903_p9 = pnand %p902_p4, %p896_p10 }
 0x3b4   : > { %906 = shalt.err (!%p903_p9)
}
 0x3b5   : > { %s907_s19 = scalar_lea.hbm %s1234_s11, 128  ;;  %s911_s9 = scalar_lea.hbm %s1301_s3, 256 }
 0x3b6   : > { %p908_p11 = scmp.ne.s32.totalorder %s1234_s11, %s907_s19  ;;  %p912_p8 = scmp.lt.s32.totalorder %s1234_s11, %s1301_s3 }
 0x3b7   : > { %p913_p6 = scmp.lt.s32.totalorder %s911_s9, %s907_s19 }
 0x3b8   : > { %p909_p3 = pnand %p908_p11, %p1311_p1 }
 0x3b9   : > { %p914_p13 = por %p913_p6, %p912_p8 }
 0x3ba   : > { %p910_p5 = pneg %p909_p3 }
 0x3bc   : > { %p915_p12 = pnand %p914_p13, %p910_p5 }
 0x3be   : > { %918 = shalt.err (!%p915_p12)
}
 0x3bf   : > { %749 = dma.vmem_to_hbm [thread:$0]  (%p1311_p1), %s1227_s8, 128, %s1234_s11, %s551_s23  }
 0x3c0 PF: > { %s589_s26 = sand.u32 1, %s953_s12   ;;  %p1312_p7 = scmp.ne.s32.totalorder %s1307_s25, 0 }
 0x3c1   : > { %p1313_p10 = scmp.ge.s32.totalorder %s965_s15, 2  ;;  %s590_s28 = scalar_lea.sflag [#allocation7], %s589_s26 }
 0x3c3   : > { %p760_p0 = pnand %p1313_p10, %p1312_p7 }
 0x3c5   : > { %p761_p2 = pneg %p760_p0 }
 0x3c7   : > { %944 = dma.done.wait (%p761_p2), %s590_s28, 128  }
 0x3c8   : > { %946 = vsyncadd (%p761_p2), %s590_s28, 4294967168  ;;  %s599_s30 = scalar_lea.sflag [#allocation12], %s589_s26 }
 0x3c9   : > { %948 = dma.done.wait (%p761_p2), %s599_s30, 128  }
 0x3ca   : > { %950 = vsyncadd (%p761_p2), %s599_s30, 4294967168  ;;  %p23_p1 = scmp.ge.s32.totalorder %s1027_s18, 4   ;;  %s1314_s12 = smov %s957_s13 }
 0x3cb   : > { %s1315_s13 = smov %s961_s14  ;;  %s1316_s14 = smov %s1039_s21 }
 0x3cc   : > { %s1317_s15 = smov %s1027_s18  ;;  %25 = sbr.rel (!%p23_p1) target bundleno = 9 (0x9), region = 109 }
 0x3d1   :  { %604 = vsyncpa [#allocation6], 1 }
 0x3d2   :  { %606 = vsyncpa [#allocation6 + $0x1], 1 }
 0x3d3   :  { %607 = vsyncpa [#allocation9], 1 }
 0x3d4   :  { %609 = vsyncpa [#allocation9 + $0x1], 1 }
 0x3d5   :  { %610 = vsyncpa [#allocation7], 1 }
 0x3d6   :  { %612 = vsyncpa [#allocation7 + $0x1], 1 }
 0x3d7   :  { %613 = vsyncpa [#allocation12], 1 }
 0x3d8   :  { %615 = vsyncpa [#allocation12 + $0x1], 1 }

</bundles_post_ra>
